<compile_context>
chip_gen: v7x
topology: tpu7x:2x2x1
jax: 0.10.0
libtpu: 0.0.40
codegen_flags: <defaults>
</compile_context>

<pallas_src>
import functools

import jax
import jax.numpy as jnp
from jax.experimental import pallas as pl
from jax.experimental.pallas import tpu as pltpu


def _dmsad_kernel(x_ref, st_ref, cm2_ref, c2_ref, out_ref, *,
                  eta, eps, n_total, block_n, tiles_per_core, num_tiles):
    """One (core, N-tile) grid step.

    x_ref   : (block_n, D) native dtype (f32/bf16) sample tile
    st_ref  : (1, block_n) f32 semi targets in {-1, 0, +1}, lane-major
    cm2_ref : (K, D)       native dtype, pre-scaled centers (-2 * c), resident
    c2_ref  : (K, 1)       f32 ||c_k||^2 (hoisted), resident
    out_ref : (8, 128)     f32 per-core lane-bucket partial sums (resident acc)
    """
    p = pl.program_id(0)              # core slot (parallel axis)
    i = pl.program_id(1)              # N tile within this core (arbitrary axis)
    tile = p * tiles_per_core + i     # UN-clamped global tile id, for masking

    @pl.when(i == 0)
    def _init():
        out_ref[...] = jnp.zeros_like(out_ref)

    x = x_ref[...]                    # (block_n, D) native dtype
    st = st_ref[...]                  # (1, block_n) f32
    c2 = c2_ref[...]                  # (K, 1) f32

    dims = (((1,), (1,)), ((), ()))   # contract over D of both operands

    # xc[k, n] = -2 * c_k . x_n  -> (K, block_n).  Samples stay lane-major and
    # the MXU runs in the streamed dtype (bf16 x => bf16 matmul), f32 accum.
    xc = jax.lax.dot_general(cm2_ref[...], x, dims,
                             preferred_element_type=jnp.float32)

    # ||x_n||^2 via an 8-row ones matmul so x is read once from HBM and the
    # result lands lane-major.  Upcast the loaded tile to f32 for the square
    # (v5e VPU has no bf16); the (block_n, D) f32 temps are counted in the
    # wrapper's VMEM budget.
    xf = x.astype(jnp.float32)
    ones8 = jnp.ones((8, xf.shape[1]), dtype=jnp.float32)
    x2 = jax.lax.dot_general(ones8, xf * xf, dims,
                             preferred_element_type=jnp.float32)[0:1, :]  # (1, block_n)

    # min_k ||x_n - c_k||^2 : sqrt is monotone so min of d^2 suffices.
    # NOTE: the expanded form ||x||^2 - 2 c.x + ||c||^2 can cancel for
    # nearly-coincident, large-norm x and c; the clamp removes negatives but a
    # direct (c - x)^2 path would be needed for tighter accuracy in that regime.
    d2min = x2 + jnp.min(c2 + xc, axis=0, keepdims=True)                  # (1, block_n)
    d2min = jnp.maximum(d2min, 0.0)

    # losses = where(t == 0, d2, eta * (d2 + eps)**t), t in {-1, 0, +1}:
    # the pow collapses to a select between (d2 + eps) and 1/(d2 + eps).
    r = d2min + eps
    powed = eta * jnp.where(st > 0.0, r, 1.0 / r)   # exact recip keeps tolerance
    losses = jnp.where(st == 0.0, d2min, powed)                           # (1, block_n)

    # Mask the ragged tail and any duplicated (index-clamped) padded grid slot.
    col = jax.lax.broadcasted_iota(jnp.int32, (1, block_n), 1)
    valid = (tile * block_n + col) < n_total
    losses = jnp.where(valid, losses, 0.0)

    # Reduce the tile to (1, 128) lane partials with plain VPU adds (no XLU
    # cross-lane reduce) and accumulate into 128 per-core lane buckets; the
    # wrapper does the final sum + single exact divide.  Bounds accumulation
    # drift vs. a single f32 scalar for very large N.
    nb = block_n // 128
    if nb == 0:                                   # tiny-N single tile (N < 128)
        out_ref[0:1, 0:block_n] += losses
    else:
        partial = losses[:, 0:128]
        for j in range(1, nb):
            partial = partial + losses[:, j * 128:(j + 1) * 128]
        out_ref[0:1, :] += partial
        rem = block_n - nb * 128                  # 0 by construction in wrapper
        if rem:
            out_ref[0:1, 0:rem] += losses[:, nb * 128:block_n]


def _pick_block_n(n, d, in_bytes, *, target_tile_bytes=4 << 20,
                  budget_bytes=40 << 20):
    """Pick an N-tile size: ~4 MiB x tiles, capped by an honest VMEM budget
    (2 pipeline buffers in native dtype + f32 upcast/square temps + epilogue),
    kept under ~40 MiB so it also fits v7x's 64 MiB per-TC VMEM."""
    per_row = d * (2 * in_bytes + 4 + (0 if in_bytes >= 4 else 4)) + 64
    if n < 128:
        return int(n), int(per_row)
    bn = max(128, (target_tile_bytes // (d * in_bytes)) // 128 * 128)
    bn = min(bn, max(128, (budget_bytes // per_row) // 128 * 128))
    bn = min(bn, 32768)                       # avoid silly-huge tiles at tiny D
    bn = min(bn, (n // 128) * 128)            # never exceed the array extent
    return int(bn), int(per_row)


def dmsad_loss(x, c, semi_target, *, eta=0.5, eps=1e-6, block_n=None):
    """DMSAD loss.  x: (N, D) f32/bf16 streamed in its native dtype,
    c: (K, D), semi_target: (N,) — MUST be in {-1, 0, +1} (the pow collapse in
    the kernel assumes exactly that domain; other values take a wrong branch).
    """
    N, D = x.shape
    K = c.shape[0]
    in_bytes = x.dtype.itemsize

    auto_bn, per_row = _pick_block_n(N, D, in_bytes)
    if block_n is None:
        block_n = auto_bn
    elif N < 128:
        block_n = N
    else:
        block_n = max(128, (int(block_n) // 128) * 128)
        block_n = min(block_n, (N // 128) * 128)

    num_tiles = -(-N // block_n)
    num_cores = 2                              # v7x megacore split; harmless (sequential) on 1-TC chips
    tiles_per_core = -(-num_tiles // num_cores)

    # Tiny one-off preprocessing on (K, D): hoisted ||c||^2 and the -2 scale,
    # so the kernel does min(c2 + (-2c).x) with no per-tile rescale of x.
    c_f = c.astype(jnp.float32)
    c2 = jnp.sum(c_f * c_f, axis=1, keepdims=True)            # (K, 1) f32
    cm2 = (-2.0 * c_f).astype(x.dtype)                        # matmul runs in x's dtype
    st = semi_target.astype(jnp.float32).reshape(1, N)        # (1, N) lane-major

    # Honest per-call VMEM request: block_n-dependent part + resident constants.
    footprint = (block_n * per_row + K * D * (in_bytes + 4)
                 + num_cores * 8 * 128 * 4 + (1 << 20))
    vmem_limit = int(min(max(footprint + (4 << 20), 16 << 20), 48 << 20))

    def x_map(p, i):          # clamp so padded grid slots re-read the last tile
        return (jnp.minimum(p * tiles_per_core + i, num_tiles - 1), 0)

    def st_map(p, i):
        return (0, jnp.minimum(p * tiles_per_core + i, num_tiles - 1))

    kernel = functools.partial(
        _dmsad_kernel, eta=float(eta), eps=float(eps), n_total=int(N),
        block_n=int(block_n), tiles_per_core=int(tiles_per_core),
        num_tiles=int(num_tiles))

    partials = pl.pallas_call(
        kernel,
        out_shape=jax.ShapeDtypeStruct((num_cores * 8, 128), jnp.float32),
        grid=(num_cores, tiles_per_core),
        in_specs=[
            pl.BlockSpec((block_n, D), x_map),                     # x tile (native dtype)
            pl.BlockSpec((1, block_n), st_map),                    # semi targets
            pl.BlockSpec(memory_space=pltpu.MemorySpace.VMEM),     # -2*c (resident)
            pl.BlockSpec(memory_space=pltpu.MemorySpace.VMEM),     # ||c||^2 (resident)
        ],
        out_specs=pl.BlockSpec((8, 128), lambda p, i: (p, 0)),     # per-core lane buckets
        compiler_params=pltpu.CompilerParams(
            dimension_semantics=("parallel", "arbitrary"),
            vmem_limit_bytes=vmem_limit),
    )(x, st, cm2, c2)

    # Final cross-core / cross-lane reduction and single exact divide by N.
    return jnp.sum(partials) / N


def _dmsad_loss_ref(x, c, semi_target, *, eta=0.5, eps=1e-6):
    """Pure-JAX reference mirroring the torch forward."""
    diff = c[None, :, :] - x[:, None, :]                                  # (N, K, D)
    dist = jnp.min(jnp.sqrt(jnp.sum(diff * diff, axis=2)), axis=1)        # (N,)
    t = semi_target.astype(jnp.float32)
    losses = jnp.where(semi_target == 0, dist ** 2, eta * (dist ** 2 + eps) ** t)
    return jnp.mean(losses)


if __name__ == "__main__":
    key = jax.random.PRNGKey(0)
    k1, k2, k3, k4, k5 = jax.random.split(key, 5)
    eta, eps = 0.7, 1e-6
    D, K = 64, 4

    # Dataset A: N not a multiple of 128 -> ragged-tail masking.
    N = 200
    x = jax.random.normal(k1, (N, D), dtype=jnp.float32)
    c = jax.random.normal(k2, (K, D), dtype=jnp.float32)
    semi_target = jax.random.randint(k3, (N,), -1, 2, dtype=jnp.int32)    # {-1, 0, 1}
    ref = _dmsad_loss_ref(x, c, semi_target, eta=eta, eps=eps)

    loss = dmsad_loss(x, c, semi_target, eta=eta, eps=eps)                # auto tile size
    jax.block_until_ready(loss)
    assert jnp.allclose(loss, ref, rtol=1e-4, atol=1e-5), (loss, ref)

    # Dataset B: odd tile count -> exercises the clamped padded grid slot of
    # the 2-way core split as well as the ragged tail.
    N2 = 333
    x2 = jax.random.normal(k4, (N2, D), dtype=jnp.float32)
    st2 = jax.random.randint(k5, (N2,), -1, 2, dtype=jnp.int32)
    ref2 = _dmsad_loss_ref(x2, c, st2, eta=eta, eps=eps)
    loss2 = dmsad_loss(x2, c, st2, eta=eta, eps=eps, block_n=128)
    jax.block_until_ready(loss2)
    assert jnp.allclose(loss2, ref2, rtol=1e-4, atol=1e-5), (loss2, ref2)

    # bf16 streaming path: x kept in its native dtype end-to-end (half the HBM
    # traffic, bf16 MXU); loose tolerance vs. the f32 reference.
    loss_bf16 = dmsad_loss(x.astype(jnp.bfloat16), c, semi_target, eta=eta, eps=eps)
    jax.block_until_ready(loss_bf16)
    assert jnp.allclose(loss_bf16, ref, rtol=5e-2, atol=1e-3), (loss_bf16, ref)

    print("KERNEL_OK")
</pallas_src>

<mosaic_0001>
module attributes {stable_mosaic.version = 11 : i64} {
  func.func @_dmsad_kernel(%arg0: i32, %arg1: i32, %arg2: memref<128x64xf32, #tpu.memory_space<vmem>>, %arg3: memref<1x128xf32, #tpu.memory_space<vmem>>, %arg4: memref<4x64xf32, #tpu.memory_space<vmem>>, %arg5: memref<4x1xf32, #tpu.memory_space<vmem>>, %arg6: memref<8x128xf32, #tpu.memory_space<vmem>>) attributes {dimension_semantics = [#tpu.dimension_semantics<parallel>, #tpu.dimension_semantics<arbitrary>], iteration_bounds = array<i64: 2, 1>, scalar_prefetch = 0 : i64, scratch_operands = 0 : i64, tpu.core_type = #tpu.core_type<tc>, window_params = [{transform_indices = @transform_0, window_bounds = array<i64: 128, 64>}, {transform_indices = @transform_1, window_bounds = array<i64: 1, 128>}, {pipeline_mode = #tpu.pipeline_mode<synchronous>, transform_indices = @transform_2, window_bounds = array<i64: 4, 64>}, {pipeline_mode = #tpu.pipeline_mode<synchronous>, transform_indices = @transform_3, window_bounds = array<i64: 4, 1>}, {transform_indices = @transform_4, window_bounds = array<i64: 8, 128>}]} {
    %c1_i32 = arith.constant 1 : i32
    %0 = arith.muli %arg0, %c1_i32 : i32
    %1 = arith.addi %0, %arg1 : i32
    %c0_i32 = arith.constant 0 : i32
    %2 = arith.cmpi eq, %arg1, %c0_i32 : i32
    %3 = arith.extui %2 : i1 to i32
    %c0_i32_0 = arith.constant 0 : i32
    %4 = arith.cmpi ne, %3, %c0_i32_0 : i32
    scf.if %4 {
      %cst_22 = arith.constant 0.000000e+00 : f32
      %44 = vector.broadcast %cst_22 : f32 to vector<8x128xf32>
      %c0_23 = arith.constant 0 : index
      %c0_24 = arith.constant 0 : index
      %45 = vector.load %arg6[%c0_23, %c0_24] : memref<8x128xf32, #tpu.memory_space<vmem>>, vector<8x128xf32>
      tpu.vector_store %arg6[%c0_23, %c0_24], %44 {strides = array<i32>} : memref<8x128xf32, #tpu.memory_space<vmem>>, vector<8x128xf32>,
    } else {
    }
    %c0 = arith.constant 0 : index
    %c0_1 = arith.constant 0 : index
    %5 = vector.load %arg2[%c0, %c0_1] : memref<128x64xf32, #tpu.memory_space<vmem>>, vector<128x64xf32>
    %c0_2 = arith.constant 0 : index
    %c0_3 = arith.constant 0 : index
    %6 = vector.load %arg3[%c0_2, %c0_3] : memref<1x128xf32, #tpu.memory_space<vmem>>, vector<1x128xf32>
    %c0_4 = arith.constant 0 : index
    %c0_5 = arith.constant 0 : index
    %7 = vector.load %arg5[%c0_4, %c0_5] : memref<4x1xf32, #tpu.memory_space<vmem>>, vector<4x1xf32>
    %c0_6 = arith.constant 0 : index
    %c0_7 = arith.constant 0 : index
    %8 = vector.load %arg4[%c0_6, %c0_7] : memref<4x64xf32, #tpu.memory_space<vmem>>, vector<4x64xf32>
    %cst = arith.constant dense<0.000000e+00> : vector<4x128xf32>
    %9 = tpu.matmul %8, %5, %cst {dimension_numbers = #tpu.dot_dimension_numbers<[1], [1], [0], [0], [0, 0, 1, 0], [], []>} : vector<4x64xf32>, vector<128x64xf32>, vector<4x128xf32> -> vector<4x128xf32>
    %cst_8 = arith.constant 1.000000e+00 : f32
    %10 = vector.broadcast %cst_8 : f32 to vector<8x64xf32>
    %11 = arith.mulf %5, %5 : vector<128x64xf32>
    %cst_9 = arith.constant dense<0.000000e+00> : vector<8x128xf32>
    %12 = tpu.matmul %10, %11, %cst_9 {dimension_numbers = #tpu.dot_dimension_numbers<[1], [1], [0], [0], [0, 0, 1, 0], [], []>} : vector<8x64xf32>, vector<128x64xf32>, vector<8x128xf32> -> vector<8x128xf32>
    %13 = vector.extract_strided_slice %12 {offsets = [0, 0], sizes = [1, 128], strides = [1, 1]} : vector<8x128xf32> to vector<1x128xf32>
    %14 = vector.broadcast %7 : vector<4x1xf32> to vector<4x128xf32>
    %15 = arith.addf %14, %9 : vector<4x128xf32>
    %cst_10 = arith.constant dense<0x7F800000> : vector<128xf32>
    %16 = vector.multi_reduction <minimumf>, %15, %cst_10 [0] : vector<4x128xf32> to vector<128xf32>
    %17 = vector.shape_cast %16 : vector<128xf32> to vector<1x128xf32>
    %18 = arith.addf %13, %17 : vector<1x128xf32>
    %cst_11 = arith.constant 0.000000e+00 : f32
    %19 = vector.broadcast %cst_11 : f32 to vector<1x128xf32>
    %20 = arith.maximumf %18, %19 : vector<1x128xf32>
    %cst_12 = arith.constant 9.99999997E-7 : f32
    %21 = vector.broadcast %cst_12 : f32 to vector<1x128xf32>
    %22 = arith.addf %20, %21 : vector<1x128xf32>
    %cst_13 = arith.constant 0.000000e+00 : f32
    %23 = vector.broadcast %cst_13 : f32 to vector<1x128xf32>
    %24 = arith.cmpf ogt, %6, %23 : vector<1x128xf32>
    %cst_14 = arith.constant 1.000000e+00 : f32
    %25 = vector.broadcast %cst_14 : f32 to vector<1x128xf32>
    %26 = arith.divf %25, %22 : vector<1x128xf32>
    %27 = arith.select %24, %22, %26 : vector<1x128xi1>, vector<1x128xf32>
    %cst_15 = arith.constant 0.699999988 : f32
    %28 = vector.broadcast %cst_15 : f32 to vector<1x128xf32>
    %29 = arith.mulf %28, %27 : vector<1x128xf32>
    %cst_16 = arith.constant 0.000000e+00 : f32
    %30 = vector.broadcast %cst_16 : f32 to vector<1x128xf32>
    %31 = arith.cmpf oeq, %6, %30 : vector<1x128xf32>
    %32 = arith.select %31, %20, %29 : vector<1x128xi1>, vector<1x128xf32>
    %33 = tpu.iota {dimensions = array<i32: 1>} : vector<1x128xi32>
    %c128_i32 = arith.constant 128 : i32
    %34 = arith.muli %1, %c128_i32 : i32
    %35 = vector.broadcast %34 : i32 to vector<1x128xi32>
    %36 = arith.addi %35, %33 : vector<1x128xi32>
    %c200_i32 = arith.constant 200 : i32
    %37 = vector.broadcast %c200_i32 : i32 to vector<1x128xi32>
    %38 = arith.cmpi slt, %36, %37 : vector<1x128xi32>
    %cst_17 = arith.constant 0.000000e+00 : f32
    %39 = vector.broadcast %cst_17 : f32 to vector<1x128xf32>
    %40 = arith.select %38, %32, %39 : vector<1x128xi1>, vector<1x128xf32>
    %c0_18 = arith.constant 0 : index
    %c0_19 = arith.constant 0 : index
    %41 = vector.load %arg6[%c0_18, %c0_19] : memref<8x128xf32, #tpu.memory_space<vmem>>, vector<1x128xf32>
    %42 = arith.addf %41, %40 : vector<1x128xf32>
    %c0_20 = arith.constant 0 : index
    %c0_21 = arith.constant 0 : index
    %43 = vector.load %arg6[%c0_20, %c0_21] : memref<8x128xf32, #tpu.memory_space<vmem>>, vector<1x128xf32>
    tpu.vector_store %arg6[%c0_20, %c0_21], %42 {strides = array<i32>} : memref<8x128xf32, #tpu.memory_space<vmem>>, vector<1x128xf32>,
    return
  }
  func.func @transform_0(%arg0: i32, %arg1: i32) -> (i32, i32) {
    %c1_i32 = arith.constant 1 : i32
    %0 = arith.muli %arg0, %c1_i32 : i32
    %1 = arith.addi %0, %arg1 : i32
    %c1_i32_0 = arith.constant 1 : i32
    %2 = arith.minsi %1, %c1_i32_0 : i32
    %c0_i32 = arith.constant 0 : i32
    %c0_i32_1 = arith.constant 0 : i32
    return %2, %c0_i32 : i32, i32
  }
  func.func @transform_1(%arg0: i32, %arg1: i32) -> (i32, i32) {
    %c1_i32 = arith.constant 1 : i32
    %0 = arith.muli %arg0, %c1_i32 : i32
    %1 = arith.addi %0, %arg1 : i32
    %c1_i32_0 = arith.constant 1 : i32
    %2 = arith.minsi %1, %c1_i32_0 : i32
    %c0_i32 = arith.constant 0 : i32
    %c0_i32_1 = arith.constant 0 : i32
    return %c0_i32, %2 : i32, i32
  }
  func.func @transform_2(%arg0: i32, %arg1: i32) -> (i32, i32) {
    %c0_i32 = arith.constant 0 : i32
    %c0_i32_0 = arith.constant 0 : i32
    %c0_i32_1 = arith.constant 0 : i32
    return %c0_i32, %c0_i32_0 : i32, i32
  }
  func.func @transform_3(%arg0: i32, %arg1: i32) -> (i32, i32) {
    %c0_i32 = arith.constant 0 : i32
    %c0_i32_0 = arith.constant 0 : i32
    %c0_i32_1 = arith.constant 0 : i32
    return %c0_i32, %c0_i32_0 : i32, i32
  }
  func.func @transform_4(%arg0: i32, %arg1: i32) -> (i32, i32) {
    %c0_i32 = arith.constant 0 : i32
    %c0_i32_0 = arith.constant 0 : i32
    return %arg0, %c0_i32 : i32, i32
  }
}

</mosaic_0001>

<bundles_post_ra>
// kernel: tpu_custom_call.1
= control target key start
LH: loop header
LB: loop body
LE: loop exit
PB: predicated region body
PF: predicated region fallthrough
CT: control target
= control target key end

     0   :  { %9 = vsyncpa [#allocation3], 0  ;;  %s1299_s0 = inlined_call_operand.vmem [shape: f32[200,64], index: 0, kind: input, shape index: {}]   ;;  %s1300_s1 = inlined_call_operand.vmem [shape: f32[1,200], index: 1, kind: input, shape index: {}]   ;;  %s1301_s2 = inlined_call_operand.vmem [shape: f32[4,64], index: 2, kind: input, shape index: {}]   ;;  %s1302_s3 = inlined_call_operand.vmem [shape: f32[4,1], index: 3, kind: input, shape index: {}]   ;;  %s1303_s4 = inlined_call_operand.hbm [shape: f32[16,128], index: 4, kind: output, shape index: {}]  }
   0x1   :  { %11 = vsyncpa [#allocation3 + $0x1], 0  ;;  %s1086_s15 = smov 0   ;;  %s1088_s16 = smov 0  }
   0x2   :  { %s1090_s17 = smov 0   ;;  %s1092_s18 = smov 0  }
   0x3   :  { %s1094_s19 = smov 0   ;;  %s1096_s20 = smov 0  }
   0x4 LB: > { %s694_s21 = sadd.s32 4294967295, %s1053_s20   ;;  %s695_s22 = sadd.s32 4294967294, %s1053_s20   ;;  %s1053_s20 = sphi %s1096_s20, %s17_s20   ;;  %s1049_s19 = sphi %s1094_s19, %s1312_s19   ;;  %s1045_s18 = sphi %s1092_s18, %s1311_s18   ;;  %s1041_s17 = sphi %s1090_s17, %s1310_s17   ;;  %s1037_s16 = sphi %s1088_s16, %s1309_s16   ;;  %s1033_s15 = sphi %s1086_s15, %s1308_s15  }
   0x5   : > { %s29_s23 = sadd.s32 1, %s1049_s19  ;;  %s142_s24 = sadd.s32 1, %s1041_s17 }
   0x6   : > { %p31_p0 = scmp.ge.s32.totalorder %s29_s23, 2  ;;  %p152_p1 = scmp.ne.s32.totalorder %s1041_s17, %s1037_s16 }
   0x7   : > { %p153_p2 = scmp.eq.s32.totalorder %s694_s21, 1  ;;  %p158_p3 = scmp.ne.s32.totalorder %s1037_s16, %s1033_s15 }
   0x8   : > { %s1314_s23 = smov (%p31_p0, %s29_s23), 0  ;;  %p159_p5 = scmp.eq.s32.totalorder %s695_s22, 1 }
   0x9   : > { %p1126_p4 = por %p153_p2, %p152_p1  ;;  %s139_s26 = ssub.s32 %s1049_s19, %s1314_s23 }
   0xa   : > { %p698_p6 = scmp.ge.s32.totalorder %s1053_s20, 1  ;;  %p140_p7 = scmp.eq.s32.totalorder %s139_s26, 0 }
   0xb   : > { %p1133_p8 = por %p159_p5, %p158_p3  ;;  %p218_p9 = scmp.lt.s32.totalorder %s1053_s20, 3 }
   0xc   : > { %s1139_s28 = scalar_select %p140_p7, %s1041_s17, %s142_s24  }
   0xd   : > { %p219_p10 = pnand %p698_p6, %p218_p9 }
   0xe   : > { %p258_p11 = scmp.lt.s32.totalorder (!%p219_p10), %s1045_s18, 1  ;;  %s254_s29 = sand.u32 (!%p219_p10), 1, %s1037_s16   ;;  %v1055_v0 = vmov (!%p219_p10), 0.0|0.0   ;;  %vm1056_vm0 = vmmov (!%p219_p10), 0   ;;  %v1057_v1 = vmov (!%p219_p10), 0.0   ;;  %v1058_v3 = vmov (!%p219_p10), 0  }
   0xf   : > { %222 = sbr.rel (%p219_p10) target bundleno = 361 (0x169), region = 36  ;;  %848 = vmatprep.subr.bf16.mxu0 (!%p219_p10), %v1055_v0  ;;  %880 = vmatprep.subr.bf16.mxu1 (!%p219_p10), %v1055_v0  ;;  %s699_s30 = sshll.u32 (!%p219_p10), %s254_s29, 3  ;;  %v309_v2 = vld [vmem:[%s1302_s3] sm:$0xf] (!%p219_p10)  ;;  %vm311_vm1 = vcmask (!%p219_p10), 523264   ;;  %v1059_v54 = vmov (!%p219_p10), 1.0  }
  0x10   : > { %810 = vmatprep.mubr.msk.f32.mxu0 (!%p219_p10), %vm1056_vm0, %v1057_v1  ;;  %845 = vmatprep.mubr.msk.f32.mxu1 (!%p219_p10), %vm1056_vm0, %v1057_v1  ;;  %s1156_s9 = scalar_lea.vmem (!%p219_p10), [#allocation2], %s699_s30  ;;  %vm1168_vm2 = vmpackc.low (!%p219_p10), %vm311_vm1, %vm311_vm1  ;;  %v310_v53 = vld [vmem:[%s1301_s2] sm:$0xf] (!%p219_p10)  ;;  %vm576_vm3 = vcmask (!%p219_p10), 1043456   ;;  %s739_s30 = sshll.u32 (!%p219_p10), %s1045_s18, 7 }
  0x11   : > { %972 = vset.pattern.permute.xlu0 (!%p219_p10), %v1058_v3  ;;  %291 = vst [vmem:[%s1156_s9] sm:$0xff] (!%p219_p10), %v1057_v1  ;;  %s618_s6 = sshll.u32 (!%p219_p10), %s1156_s9, 4  ;;  %s1249_s7 = scalar_lea.hbm (!%p219_p10), %s1303_s4, %s739_s30  ;;  %s1251_s6 = int_to_ptr.vmem [resolvable:$true] %s618_s6 }
  0x12   : > { %572 = vperm.xlu0 (!%p219_p10), %972, %v309_v2   ;;  %s1060_s11 = smov (!%p219_p10), [#allocation2]  }
  0x13   : > { %s979_s12 = sshll.u32 (!%p219_p10), %s1060_s11, 4  ;;  %s980_s12 = int_to_ptr.vmem [resolvable:$false] %s979_s12 }
  0x14   : > { %p982_p2 = scmp.lt.s32.totalorder (!%p219_p10), %s1251_s6, %s980_s12 }
  0x16   : > { %s1150_s5 = scalar_select %p258_p11, %s1045_s18, 1 }
  0x18   : > { %s700_s8 = sshll.u32 %s1150_s5, 4  ;;  %s1318_s5 = smov (!%p258_p11, %s1150_s5), 1 }
  0x19   : > { %p265_p12 = scmp.lt.s32.totalorder %s700_s8, 24  ;;  %s282_s26 = scalar_lea.vmem %s1300_s1, %s1318_s5 }
  0x1b   : > { %s1316_s8 = smov (!%p265_p12, %s700_s8), 24 }
  0x1c   : > { %s701_s10 = sshll.u32 %s1316_s8, 3  ;;  %s605_s8 = scalar_lea.sflag [#allocation3], %s254_s29 }
  0x1d   : > { %s1162_s13 = scalar_lea.vmem %s1299_s0, %s701_s10  ;;  %s975_s10 = scalar_lea.vmem %s1251_s6, 128 }
  0x1e   : > { %v292_v4 = vld [vmem:[%s1162_s13] sm:$0xff]  ;;  %v293_v5 = vld [vmem:[%s1162_s13 + $0x8] sm:$0xff]  ;;  %v294_v11 = vld [vmem:[%s1162_s13 + $0x10] sm:$0xff]  ;;  %p976_p13 = scmp.ne.s32.totalorder %s1251_s6, %s975_s10 }
  0x1f   : > { %v849_v7 = vpack.c.bf16 %v293_v5, %v292_v4  ;;  %v433_v8 = vmul.f32 %v292_v4, %v292_v4  ;;  %v434_v9 = vmul.f32 %v293_v5, %v293_v5  ;;  %v295_v12 = vld [vmem:[%s1162_s13 + $0x18] sm:$0xff]  ;;  %v435_v13 = vmul.f32 %v294_v11, %v294_v11  ;;  %v296_v17 = vld [vmem:[%s1162_s13 + $0x20] sm:$0xff]  ;;  %v297_v18 = vld [vmem:[%s1162_s13 + $0x28] sm:$0xff] }
  0x20   : > { %v436_v14 = vmul.f32 %v295_v12, %v295_v12  ;;  %v853_v15 = vpack.c.bf16 %v295_v12, %v294_v11  ;;  %v437_v19 = vmul.f32 %v296_v17, %v296_v17  ;;  %v438_v20 = vmul.f32 %v297_v18, %v297_v18  ;;  %v298_v23 = vld [vmem:[%s1162_s13 + $0x30] sm:$0xff]  ;;  %v299_v24 = vld [vmem:[%s1162_s13 + $0x38] sm:$0xff]  ;;  %v300_v29 = vld [vmem:[%s1162_s13 + $0x40] sm:$0xff]  ;;  %p977_p0 = pnand %p976_p13, %p1126_p4 }
  0x21   : > { %851 = vmatpush3.bf16.xpose.msk.msra.mxu0 %vm1168_vm2, %v849_v7  ;;  %v881_v10 = vpack.c.bf16 %v434_v9, %v433_v8  ;;  %v857_v21 = vpack.c.bf16 %v297_v18, %v296_v17  ;;  %v439_v25 = vmul.f32 %v298_v23, %v298_v23  ;;  %v440_v26 = vmul.f32 %v299_v24, %v299_v24  ;;  %v301_v30 = vld [vmem:[%s1162_s13 + $0x48] sm:$0xff]  ;;  %v302_v35 = vld [vmem:[%s1162_s13 + $0x50] sm:$0xff]  ;;  %v303_v36 = vld [vmem:[%s1162_s13 + $0x58] sm:$0xff] }
  0x22   : > { %852 = vmatprep.subr.bf16.mxu0 %v1055_v0  ;;  %v885_v16 = vpack.c.bf16 %v436_v14, %v435_v13  ;;  %v889_v22 = vpack.c.bf16 %v438_v20, %v437_v19  ;;  %v861_v27 = vpack.c.bf16 %v299_v24, %v298_v23  ;;  %v441_v31 = vmul.f32 %v300_v29, %v300_v29  ;;  %v304_v41 = vld [vmem:[%s1162_s13 + $0x60] sm:$0xff]  ;;  %v305_v42 = vld [vmem:[%s1162_s13 + $0x68] sm:$0xff]  ;;  %v306_v47 = vld [vmem:[%s1162_s13 + $0x70] sm:$0xff]  ;;  %p978_p1 = pneg %p977_p0 }
  0x23   : > { %883 = vmatpush3.bf16.xpose.msk.msra.mxu1 %vm1168_vm2, %v881_v10  ;;  %v893_v28 = vpack.c.bf16 %v440_v26, %v439_v25  ;;  %v442_v32 = vmul.f32 %v301_v30, %v301_v30  ;;  %v865_v33 = vpack.c.bf16 %v301_v30, %v300_v29  ;;  %v443_v37 = vmul.f32 %v302_v35, %v302_v35  ;;  %v307_v48 = vld [vmem:[%s1162_s13 + $0x78] sm:$0xff]  ;;  %v308_v9 = vld [vmem:[%s282_s26] sm:$0x1]  ;;  %s981_s13 = scalar_lea.vmem %s980_s12, 256 }
  0x24   : > { %884 = vmatprep.subr.bf16.mxu1 %v1055_v0  ;;  %v444_v38 = vmul.f32 %v303_v36, %v303_v36  ;;  %v869_v39 = vpack.c.bf16 %v303_v36, %v302_v35  ;;  %v445_v43 = vmul.f32 %v304_v41, %v304_v41  ;;  %v446_v44 = vmul.f32 %v305_v42, %v305_v42  ;;  %p983_p3 = scmp.lt.s32.totalorder %s981_s13, %s975_s10 }
  0x25   : > { %v897_v34 = vpack.c.bf16 %v442_v32, %v441_v31  ;;  %v873_v45 = vpack.c.bf16 %v305_v42, %v304_v41  ;;  %v447_v49 = vmul.f32 %v306_v47, %v306_v47  ;;  %v448_v50 = vmul.f32 %v307_v48, %v307_v48 }
  0x26   : > { %v901_v40 = vpack.c.bf16 %v444_v38, %v443_v37  ;;  %v905_v46 = vpack.c.bf16 %v446_v44, %v445_v43  ;;  %v877_v51 = vpack.c.bf16 %v307_v48, %v306_v47  ;;  %v594_v7 = vlaneseq  ;;  %p984_p5 = por %p983_p3, %p982_p2 }
  0x27   : > { %v909_v52 = vpack.c.bf16 %v448_v50, %v447_v49  ;;  %v597_v10 = vstv %s739_s30  ;;  %vm587_vm4 = vcmp.gt.f32.partialorder %v308_v9, 0.0  ;;  %vm592_vm5 = vcmp.eq.f32.partialorder %v308_v9, 0.0 }
  0x28   : > { %v595_v8 = vand.u32 127, %v594_v7  ;;  %p985_p6 = pnand %p984_p5, %p978_p1 }
  0x29   : > { %855 = vmatpush3.bf16.xpose.msk.msra.mxu0 %vm1168_vm2, %v853_v15  ;;  %v601_v15 = vld [vmem:[%s1156_s9] sm:$0x1] }
  0x2a   : > { %856 = vmatprep.subr.bf16.mxu0 %v1055_v0  ;;  %v598_v11 = vadd.s32 %v597_v10, %v595_v8 }
  0x2b   : > { %887 = vmatpush3.bf16.xpose.msk.msra.mxu1 %vm1168_vm2, %v885_v16 }
  0x2c   : > { %888 = vmatprep.subr.bf16.mxu1 %v1055_v0  ;;  %vm599_vm6 = vcmp.lt.s32.totalorder %v598_v11, 200 }
  0x31   : > { %859 = vmatpush3.bf16.xpose.msk.msra.mxu0 %vm1168_vm2, %v857_v21 }
  0x32   : > { %860 = vmatprep.subr.bf16.mxu0 %v1055_v0 }
  0x33   : > { %891 = vmatpush3.bf16.xpose.msk.msra.mxu1 %vm1168_vm2, %v889_v22 }
  0x34   : > { %892 = vmatprep.subr.bf16.mxu1 %v1055_v0 }
  0x39   : > { %863 = vmatpush3.bf16.xpose.msk.msra.mxu0 %vm1168_vm2, %v861_v27 }
  0x3a   : > { %864 = vmatprep.subr.bf16.mxu0 %v1055_v0 }
  0x3b   : > { %895 = vmatpush3.bf16.xpose.msk.msra.mxu1 %vm1168_vm2, %v893_v28 }
  0x3c   : > { %896 = vmatprep.subr.bf16.mxu1 %v1055_v0 }
  0x41   : > { %867 = vmatpush3.bf16.xpose.msk.msra.mxu0 %vm1168_vm2, %v865_v33 }
  0x42   : > { %868 = vmatprep.subr.bf16.mxu0 %v1055_v0 }
  0x43   : > { %899 = vmatpush3.bf16.xpose.msk.msra.mxu1 %vm1168_vm2, %v897_v34 }
  0x44   : > { %900 = vmatprep.subr.bf16.mxu1 %v1055_v0 }
  0x49   : > { %871 = vmatpush3.bf16.xpose.msk.msra.mxu0 %vm1168_vm2, %v869_v39 }
  0x4a   : > { %872 = vmatprep.subr.bf16.mxu0 %v1055_v0 }
  0x4b   : > { %903 = vmatpush3.bf16.xpose.msk.msra.mxu1 %vm1168_vm2, %v901_v40 }
  0x4c   : > { %904 = vmatprep.subr.bf16.mxu1 %v1055_v0 }
  0x51   : > { %875 = vmatpush3.bf16.xpose.msk.msra.mxu0 %vm1168_vm2, %v873_v45 }
  0x52   : > { %876 = vmatprep.subr.bf16.mxu0 %v1055_v0 }
  0x53   : > { %907 = vmatpush3.bf16.xpose.msk.msra.mxu1 %vm1168_vm2, %v905_v46 }
  0x54   : > { %908 = vmatprep.subr.bf16.mxu1 %v1055_v0 }
  0x59   : > { %879 = vmatpush3.bf16.xpose.msk.msra.mxu0 %vm1168_vm2, %v877_v51 }
  0x5b   : > { %911 = vmatpush3.bf16.xpose.msk.msra.mxu1 %vm1168_vm2, %v909_v52 }
  0x60   : > { %811 = vmatmul.mubr.msk.f32.vlgmr.msra.gmra.mrb[0].mxu0 %vm311_vm1, %v310_v53 }
  0x62   : > { %846 = vmatmul.mubr.msk.f32.vlgmr.msra.gmra.mrb[0].mxu1 %vm311_vm1, %v1059_v54 }
  0x91   : > { %v573_v55 = vpop.permute.xlu0 %572 }
 0x133   : > { %v429_v56 = vpop.f32.mrb[0].mxu0 }
 0x134   : > { %v575_v57 = vadd.f32 %v573_v55, %v429_v56  ;;  %v812_v58 = vpop.f32.mrb[1].mxu0 }
 0x135   : > { %v566_v59 = vpop.f32.mrb[0].mxu1 }
 0x136   : > { %v577_v60 = vsel %vm576_vm3, %v575_v57, inf  ;;  %v847_v61 = vpop.f32.mrb[1].mxu1 }
 0x137   : > { %v578_v62 = vrot.slane %v577_v60, 4 }
 0x139   : > { %v579_v63 = vmin.f32 %v577_v60, %v578_v62 }
 0x13b   : > { %v580_v0 = vrot.slane %v579_v63, 2 }
 0x13d   : > { %v581_v1 = vmin.f32 %v579_v63, %v580_v0 }
 0x13f   : > { %v582_v2 = vrot.slane %v581_v1, 1 }
 0x141   : > { %v583_v3 = vmin.f32 %v581_v1, %v582_v2 }
 0x143   : > { %v584_v4 = vadd.f32 %v583_v3, %v566_v59 }
 0x145   : > { %v585_v5 = vmax.f32 %v584_v4, 0.0 }
 0x147   : > { %v586_v6 = vadd.f32 1e-06, %v585_v5 }
 0x149   : > { %973 = vrcp.f32 %v586_v6 }
 0x153   : > { %v974_v12 = vpop.eup %973 }
 0x154   : > { %v590_v13 = vsel %vm587_vm4, %v586_v6, %v974_v12 }
 0x155   : > { %v591_v14 = vmul.f32 0.7, %v590_v13 }
 0x157   : > { %v593_v16 = vsel %vm592_vm5, %v585_v5, %v591_v14 }
 0x158   : > { %v600_v17 = vsel %vm599_vm6, %v593_v16, 0.0 }
 0x159   : > { %v602_v18 = vadd.f32 %v601_v15, %v600_v17 }
 0x15b   : > { %603 = vst [vmem:[%s1156_s9] sm:$0x1] %v602_v18 }
 0x15c   : > { %988 = shalt.err (!%p985_p6)
}
 0x15d   : > { %s989_s29 = scalar_lea.hbm %s1249_s7, 128  ;;  %s993_s21 = scalar_lea.hbm %s1303_s4, 256 }
 0x15e   : > { %p990_p7 = scmp.ne.s32.totalorder %s1249_s7, %s989_s29  ;;  %p994_p11 = scmp.lt.u32.totalorder %s1249_s7, %s1303_s4 }
 0x15f   : > { %p995_p12 = scmp.lt.u32.totalorder %s993_s21, %s989_s29  ;;  %p997_p0 = scmp.lt.u32.totalorder %s989_s29, %s1249_s7 }
 0x160   : > { %p991_p9 = pnand %p990_p7, %p1126_p4 }
 0x161   : > { %p996_p13 = por %p995_p12, %p994_p11 }
 0x162   : > { %p992_p10 = pneg %p991_p9 }
 0x163   : > { %p998_p1 = por %p997_p0, %p996_p13 }
 0x165   : > { %p999_p2 = pnand %p998_p1, %p992_p10 }
 0x167   : > { %1002 = shalt.err (!%p999_p2)
}
 0x168   : > { %912 = dma.vmem_to_hbm [thread:$0]  (%p1126_p4), %s1251_s6, 128, %s1249_s7, %s605_s8  }
 0x169 PF: > { %p918_p3 = scmp.ge.s32.totalorder %s1053_s20, 2  ;;  %s630_s26 = sand.u32 1, %s1033_s15  }
 0x16a   : > { %s631_s30 = scalar_lea.sflag [#allocation3], %s630_s26 }
 0x16b   : > { %p915_p5 = pnand %p918_p3, %p1133_p8 }
 0x16d   : > { %1028 = dma.done.wait (!%p915_p5), %s631_s30, 128  }
 0x16e   : > { %1030 = vsyncadd (!%p915_p5), %s631_s30, 4294967168  ;;  %s17_s20 = sadd.s32 1, %s1053_s20   ;;  %s1308_s15 = smov %s1037_s16 }
 0x16f   : > { %p14_p6 = scmp.ge.s32.totalorder %s17_s20, 4   ;;  %s1309_s16 = smov %s1041_s17 }
 0x170   : > { %s1310_s17 = smov %s1139_s28  ;;  %s1311_s18 = smov %s1049_s19 }
 0x171   : > { %s1312_s19 = smov %s1314_s23  ;;  %16 = sbr.rel (!%p14_p6) target bundleno = 4 (0x4), region = 78 }
 0x178   :  { %636 = vsyncpa [#allocation3], 1 }
 0x179   :  { %638 = vsyncpa [#allocation3 + $0x1], 1 }

</bundles_post_ra>
